<compile_context>
chip_gen: v7x
topology: tpu7x:2x2x1
jax: 0.10.0
libtpu: 0.0.40
codegen_flags: <defaults>
</compile_context>

<pallas_src>
import functools

import jax
import jax.numpy as jnp
from jax.experimental import pallas as pl
from jax.experimental.pallas import tpu as pltpu


# ----------------------------------------------------------------------------
# In-kernel helpers (traced into the single fused kernel)
# ----------------------------------------------------------------------------
def _pad_upsample(x, pad, upsample):
    """Fused nearest-2x upsample + zero halo padding as ONE exact 0/1 selection
    matmul.  x: (C, T) f32, time in lanes -> (C, 2*T + 2*pad) or (C, T + 2*pad)."""
    C, T = x.shape
    T_up = 2 * T if upsample else T
    Tp = T_up + 2 * pad
    src = jax.lax.broadcasted_iota(jnp.int32, (T, Tp), 0)
    col = jax.lax.broadcasted_iota(jnp.int32, (T, Tp), 1)
    t = col - pad
    if upsample:
        sel = (t == 2 * src) | (t == 2 * src + 1)      # nearest: up[2s] = up[2s+1] = x[s]
    else:
        sel = (t == src)
    return jnp.dot(x, sel.astype(jnp.float32), preferred_element_type=jnp.float32)


def _maxpool2(x):
    """MaxPool1d(kernel=2, stride=2) over the lane (time) dim via two exact 0/1
    selection matmuls + element-wise max."""
    C, T = x.shape
    Th = T // 2
    r = jax.lax.broadcasted_iota(jnp.int32, (T, Th), 0)
    c = jax.lax.broadcasted_iota(jnp.int32, (T, Th), 1)
    even = (r == 2 * c).astype(jnp.float32)
    odd = (r == 2 * c + 1).astype(jnp.float32)
    return jnp.maximum(
        jnp.dot(x, even, preferred_element_type=jnp.float32),
        jnp.dot(x, odd, preferred_element_type=jnp.float32))


def _tcn_block(x, w_ref, b_ref, K, pad, *, upsample, pool):
    """One TCN_Block (+ fused Upsample prologue / MaxPool epilogue).
    x: (Cin, T) f32.  w_ref: (Cout, K*Cin) bf16 fused-tap weight.  b_ref: (Cout, 1) f32."""
    xp = _pad_upsample(x, pad, upsample)                     # (Cin, Tp)
    Tp = xp.shape[-1]
    T_conv = Tp - K + 1

    # im2col over the K taps -> single MXU matmul with contraction depth K*Cin.
    cols = jnp.concatenate([xp[:, k:k + T_conv] for k in range(K)], axis=0)  # (K*Cin, T_conv)
    acc = jnp.dot(w_ref[...], cols.astype(w_ref.dtype),
                  preferred_element_type=jnp.float32)        # (Cout, T_conv)
    acc = acc + b_ref[...]                                   # (Cout, 1) lane-broadcast

    # TODO(synk): nn.Dropout is identity at inference; training-mode dropout not implemented.
    acc = jnp.maximum(acc, 0.0)                              # 'norm_relu'
    mx = jnp.max(acc, axis=-1, keepdims=True)                # per-channel max over time
    act = acc * pl.reciprocal(mx + 1e-5, approx=True)        # EUP reciprocal, frees VALU

    if pool:
        act = _maxpool2(act)                                 # fused MaxPool1d(2)
    return act


# ----------------------------------------------------------------------------
# The single fused kernel: full ED-TCN forward for one batch element
# ----------------------------------------------------------------------------
def _ed_tcn_kernel(*refs, K, pad, n_enc, n_dec):
    it = iter(refs)
    x_ref = next(it)
    enc = [(next(it), next(it)) for _ in range(n_enc)]
    dec = [(next(it), next(it)) for _ in range(n_dec)]
    wfc_ref = next(it)
    bfc_ref = next(it)
    o_ref = next(it)

    x = x_ref[0].astype(jnp.float32)                         # (n_feat, T), time in lanes

    for (w_ref, b_ref) in enc:                               # encoder: TCN_Block + MaxPool1d(2)
        x = _tcn_block(x, w_ref, b_ref, K, pad, upsample=False, pool=True)

    for (w_ref, b_ref) in dec:                               # decoder: Upsample(2) + TCN_Block
        x = _tcn_block(x, w_ref, b_ref, K, pad, upsample=True, pool=False)

    # TimeDistributed(Linear) over channels + softmax over classes (dim=1).
    logits = jnp.dot(wfc_ref[...], x.astype(wfc_ref.dtype),
                     preferred_element_type=jnp.float32) + bfc_ref[...]
    m = jnp.max(logits, axis=0, keepdims=True)
    e = jnp.exp(logits - m)
    s = jnp.sum(e, axis=0, keepdims=True)
    o_ref[0] = (e * pl.reciprocal(s, approx=True)).astype(o_ref.dtype)


# ----------------------------------------------------------------------------
# Wrapper: whole forward in one pallas_call
# ----------------------------------------------------------------------------
def ed_tcn_forward(params, x_nct, conv_len):
    """x_nct: (N, n_feat, T) PyTorch NCT layout -> (N, n_classes, T), softmax over dim=1."""
    B, n_feat, T = x_nct.shape
    K = conv_len
    pad = conv_len // 2
    n_enc = len(params["encoder"])
    n_dec = len(params["decoder"])
    assert K % 2 == 1, "odd conv_len so Conv1d preserves length (as the PyTorch arch assumes)"
    assert T % (2 ** n_enc) == 0, (
        "T must be divisible by 2**n_layers so MaxPool/Upsample round-trip the length")

    inputs = [x_nct]
    in_specs = [pl.BlockSpec((1, n_feat, T), lambda b: (b, 0, 0))]

    def add_conv(w, b):
        Cout, Cin, Kw = w.shape
        assert Kw == K
        # weight_norm is assumed pre-folded into the effective Conv1d weight.
        # Fused-tap weight:  W_eff[o, k*Cin + c] = W[o, c, k]
        w_eff = jnp.transpose(w, (0, 2, 1)).reshape(Cout, K * Cin).astype(jnp.bfloat16)
        b2 = b.reshape(Cout, 1).astype(jnp.float32)
        inputs.append(w_eff)
        inputs.append(b2)
        # Block index constant across the batch grid -> weights DMA'd once, stay VMEM-resident.
        in_specs.append(pl.BlockSpec((Cout, K * Cin), lambda b_: (0, 0)))
        in_specs.append(pl.BlockSpec((Cout, 1), lambda b_: (0, 0)))

    for (w, b) in params["encoder"]:
        add_conv(w, b)
    for (w, b) in params["decoder"]:
        add_conv(w, b)

    wfc, bfc = params["fc"]                                  # nn.Linear layout (n_classes, Cout)
    n_classes, c_fc = wfc.shape
    inputs += [wfc.astype(jnp.bfloat16), bfc.reshape(n_classes, 1).astype(jnp.float32)]
    in_specs += [pl.BlockSpec((n_classes, c_fc), lambda b: (0, 0)),
                 pl.BlockSpec((n_classes, 1), lambda b: (0, 0))]

    kern = functools.partial(_ed_tcn_kernel, K=K, pad=pad, n_enc=n_enc, n_dec=n_dec)
    return pl.pallas_call(
        kern,
        out_shape=jax.ShapeDtypeStruct((B, n_classes, T), jnp.float32),
        grid=(B,),
        in_specs=in_specs,
        out_specs=pl.BlockSpec((1, n_classes, T), lambda b: (b, 0, 0)),
        compiler_params=pltpu.CompilerParams(dimension_semantics=("parallel",)),
    )(*inputs)


# ----------------------------------------------------------------------------
# Parameter init matching the PyTorch module's channel wiring
# ----------------------------------------------------------------------------
def init_params(key, n_feat, n_nodes, n_classes, conv_len):
    n_layers = len(n_nodes)
    params = {"encoder": [], "decoder": []}
    keys = jax.random.split(key, 2 * n_layers + 1)
    ki = 0
    for i in range(n_layers):                                # encoder convs (out, in, K)
        cin = n_feat if i == 0 else n_nodes[i - 1]
        cout = n_nodes[i]
        w = jax.random.normal(keys[ki], (cout, cin, conv_len), jnp.float32)
        w = w / jnp.sqrt(cin * conv_len)
        b = jnp.zeros((cout,), jnp.float32) + 0.01
        params["encoder"].append((w, b))
        ki += 1
    for i in range(n_layers):                                # decoder convs
        cin = n_nodes[-1] if i == 0 else n_nodes[-i]
        cout = n_nodes[-i - 1]
        w = jax.random.normal(keys[ki], (cout, cin, conv_len), jnp.float32)
        w = w / jnp.sqrt(cin * conv_len)
        b = jnp.zeros((cout,), jnp.float32) + 0.01
        params["decoder"].append((w, b))
        ki += 1
    wfc = jax.random.normal(keys[ki], (n_classes, n_nodes[0]), jnp.float32)
    wfc = wfc / jnp.sqrt(n_nodes[0])
    bfc = jnp.zeros((n_classes,), jnp.float32)
    params["fc"] = (wfc, bfc)
    return params


if __name__ == "__main__":
    # Small, forward-consistent shapes.
    B, n_feat, T = 2, 8, 16
    n_nodes = [16, 32]
    n_classes = 4
    conv_len = 5                                             # odd -> conv preserves length

    key = jax.random.PRNGKey(0)
    kx, kp = jax.random.split(key)
    x = jax.random.normal(kx, (B, n_feat, T), jnp.float32)   # PyTorch NCT input
    params = init_params(kp, n_feat, n_nodes, n_classes, conv_len)

    fwd = jax.jit(functools.partial(ed_tcn_forward, conv_len=conv_len))
    out = fwd(params, x)
    out = jax.block_until_ready(out)

    assert out.shape == (B, n_classes, T), out.shape
    assert bool(jnp.all(jnp.isfinite(out)))
    # softmax over dim=1 (classes) should sum to ~1 (approx EUP reciprocal => loose tol)
    sums = jnp.sum(out, axis=1)
    assert bool(jnp.all(jnp.abs(sums - 1.0) < 1e-2)), float(jnp.max(jnp.abs(sums - 1.0)))
    print("KERNEL_OK")
</pallas_src>

<mosaic_0001>
module attributes {stable_mosaic.version = 11 : i64} {
  func.func @_ed_tcn_kernel(%arg0: i32, %arg1: memref<1x8x16xf32, #tpu.memory_space<vmem>>, %arg2: memref<16x40xbf16, #tpu.memory_space<vmem>>, %arg3: memref<16x1xf32, #tpu.memory_space<vmem>>, %arg4: memref<32x80xbf16, #tpu.memory_space<vmem>>, %arg5: memref<32x1xf32, #tpu.memory_space<vmem>>, %arg6: memref<32x160xbf16, #tpu.memory_space<vmem>>, %arg7: memref<32x1xf32, #tpu.memory_space<vmem>>, %arg8: memref<16x160xbf16, #tpu.memory_space<vmem>>, %arg9: memref<16x1xf32, #tpu.memory_space<vmem>>, %arg10: memref<4x16xbf16, #tpu.memory_space<vmem>>, %arg11: memref<4x1xf32, #tpu.memory_space<vmem>>, %arg12: memref<1x4x16xf32, #tpu.memory_space<vmem>>) attributes {dimension_semantics = [#tpu.dimension_semantics<parallel>], iteration_bounds = array<i64: 2>, scalar_prefetch = 0 : i64, scratch_operands = 0 : i64, tpu.core_type = #tpu.core_type<tc>, window_params = [{transform_indices = @transform_0, window_bounds = array<i64: 1, 8, 16>}, {pipeline_mode = #tpu.pipeline_mode<synchronous>, transform_indices = @transform_1, window_bounds = array<i64: 16, 40>}, {pipeline_mode = #tpu.pipeline_mode<synchronous>, transform_indices = @transform_2, window_bounds = array<i64: 16, 1>}, {pipeline_mode = #tpu.pipeline_mode<synchronous>, transform_indices = @transform_3, window_bounds = array<i64: 32, 80>}, {pipeline_mode = #tpu.pipeline_mode<synchronous>, transform_indices = @transform_4, window_bounds = array<i64: 32, 1>}, {pipeline_mode = #tpu.pipeline_mode<synchronous>, transform_indices = @transform_5, window_bounds = array<i64: 32, 160>}, {pipeline_mode = #tpu.pipeline_mode<synchronous>, transform_indices = @transform_6, window_bounds = array<i64: 32, 1>}, {pipeline_mode = #tpu.pipeline_mode<synchronous>, transform_indices = @transform_7, window_bounds = array<i64: 16, 160>}, {pipeline_mode = #tpu.pipeline_mode<synchronous>, transform_indices = @transform_8, window_bounds = array<i64: 16, 1>}, {pipeline_mode = #tpu.pipeline_mode<synchronous>, transform_indices = @transform_9, window_bounds = array<i64: 4, 16>}, {pipeline_mode = #tpu.pipeline_mode<synchronous>, transform_indices = @transform_10, window_bounds = array<i64: 4, 1>}, {transform_indices = @transform_11, window_bounds = array<i64: 1, 4, 16>}]} {
    %c0 = arith.constant 0 : index
    %c0_0 = arith.constant 0 : index
    %c0_1 = arith.constant 0 : index
    %0 = vector.load %arg1[%c0, %c0_0, %c0_1] : memref<1x8x16xf32, #tpu.memory_space<vmem>>, vector<1x8x16xf32>
    %1 = vector.shape_cast %0 : vector<1x8x16xf32> to vector<8x16xf32>
    %2 = tpu.iota {dimensions = array<i32: 0>} : vector<16x20xi32>
    %3 = tpu.iota {dimensions = array<i32: 1>} : vector<16x20xi32>
    %c2_i32 = arith.constant 2 : i32
    %4 = vector.broadcast %c2_i32 : i32 to vector<16x20xi32>
    %5 = arith.subi %3, %4 : vector<16x20xi32>
    %6 = arith.cmpi eq, %5, %2 : vector<16x20xi32>
    %7 = arith.extui %6 : vector<16x20xi1> to vector<16x20xi32>
    %8 = arith.sitofp %7 : vector<16x20xi32> to vector<16x20xf32>
    %cst = arith.constant dense<0.000000e+00> : vector<8x20xf32>
    %9 = tpu.matmul %1, %8, %cst {dimension_numbers = #tpu.dot_dimension_numbers<[1], [0], [0], [1], [0, 0, 1, 1], [], []>} : vector<8x16xf32>, vector<16x20xf32>, vector<8x20xf32> -> vector<8x20xf32>
    %10 = vector.extract_strided_slice %9 {offsets = [0, 0], sizes = [8, 16], strides = [1, 1]} : vector<8x20xf32> to vector<8x16xf32>
    %11 = vector.extract_strided_slice %9 {offsets = [0, 1], sizes = [8, 16], strides = [1, 1]} : vector<8x20xf32> to vector<8x16xf32>
    %12 = vector.extract_strided_slice %9 {offsets = [0, 2], sizes = [8, 16], strides = [1, 1]} : vector<8x20xf32> to vector<8x16xf32>
    %13 = vector.extract_strided_slice %9 {offsets = [0, 3], sizes = [8, 16], strides = [1, 1]} : vector<8x20xf32> to vector<8x16xf32>
    %14 = vector.extract_strided_slice %9 {offsets = [0, 4], sizes = [8, 16], strides = [1, 1]} : vector<8x20xf32> to vector<8x16xf32>
    %15 = tpu.concatenate %10, %11, %12, %13, %14 in 0 : vector<8x16xf32>, vector<8x16xf32>, vector<8x16xf32>, vector<8x16xf32>, vector<8x16xf32> -> vector<40x16xf32>
    %c0_2 = arith.constant 0 : index
    %c0_3 = arith.constant 0 : index
    %16 = vector.load %arg2[%c0_2, %c0_3] : memref<16x40xbf16, #tpu.memory_space<vmem>>, vector<16x40xbf16>
    %17 = arith.truncf %15 : vector<40x16xf32> to vector<40x16xbf16>
    %cst_4 = arith.constant dense<0.000000e+00> : vector<16x16xf32>
    %18 = tpu.matmul %16, %17, %cst_4 {dimension_numbers = #tpu.dot_dimension_numbers<[1], [0], [0], [1], [0, 0, 1, 1], [], []>} : vector<16x40xbf16>, vector<40x16xbf16>, vector<16x16xf32> -> vector<16x16xf32>
    %c0_5 = arith.constant 0 : index
    %c0_6 = arith.constant 0 : index
    %19 = vector.load %arg3[%c0_5, %c0_6] : memref<16x1xf32, #tpu.memory_space<vmem>>, vector<16x1xf32>
    %20 = vector.broadcast %19 : vector<16x1xf32> to vector<16x16xf32>
    %21 = arith.addf %18, %20 : vector<16x16xf32>
    %cst_7 = arith.constant 0.000000e+00 : f32
    %22 = vector.broadcast %cst_7 : f32 to vector<16x16xf32>
    %23 = arith.maximumf %21, %22 : vector<16x16xf32>
    %cst_8 = arith.constant dense<0xFF800000> : vector<16xf32>
    %24 = vector.multi_reduction <maximumf>, %23, %cst_8 [1] : vector<16x16xf32> to vector<16xf32>
    %25 = vector.shape_cast %24 : vector<16xf32> to vector<16x1xf32>
    %cst_9 = arith.constant 9.99999974E-6 : f32
    %26 = vector.broadcast %cst_9 : f32 to vector<16x1xf32>
    %27 = arith.addf %25, %26 : vector<16x1xf32>
    %28 = tpu.reciprocal %27 {approx = true} : vector<16x1xf32> -> vector<16x1xf32>
    %29 = vector.broadcast %28 : vector<16x1xf32> to vector<16x16xf32>
    %30 = arith.mulf %23, %29 : vector<16x16xf32>
    %31 = tpu.iota {dimensions = array<i32: 0>} : vector<16x8xi32>
    %32 = tpu.iota {dimensions = array<i32: 1>} : vector<16x8xi32>
    %c2_i32_10 = arith.constant 2 : i32
    %33 = vector.broadcast %c2_i32_10 : i32 to vector<16x8xi32>
    %34 = arith.muli %33, %32 : vector<16x8xi32>
    %35 = arith.cmpi eq, %31, %34 : vector<16x8xi32>
    %36 = arith.extui %35 : vector<16x8xi1> to vector<16x8xi32>
    %37 = arith.sitofp %36 : vector<16x8xi32> to vector<16x8xf32>
    %c2_i32_11 = arith.constant 2 : i32
    %38 = vector.broadcast %c2_i32_11 : i32 to vector<16x8xi32>
    %39 = arith.muli %38, %32 : vector<16x8xi32>
    %c1_i32 = arith.constant 1 : i32
    %40 = vector.broadcast %c1_i32 : i32 to vector<16x8xi32>
    %41 = arith.addi %39, %40 : vector<16x8xi32>
    %42 = arith.cmpi eq, %31, %41 : vector<16x8xi32>
    %43 = arith.extui %42 : vector<16x8xi1> to vector<16x8xi32>
    %44 = arith.sitofp %43 : vector<16x8xi32> to vector<16x8xf32>
    %cst_12 = arith.constant dense<0.000000e+00> : vector<16x8xf32>
    %45 = tpu.matmul %30, %37, %cst_12 {dimension_numbers = #tpu.dot_dimension_numbers<[1], [0], [0], [1], [0, 0, 1, 1], [], []>} : vector<16x16xf32>, vector<16x8xf32>, vector<16x8xf32> -> vector<16x8xf32>
    %cst_13 = arith.constant dense<0.000000e+00> : vector<16x8xf32>
    %46 = tpu.matmul %30, %44, %cst_13 {dimension_numbers = #tpu.dot_dimension_numbers<[1], [0], [0], [1], [0, 0, 1, 1], [], []>} : vector<16x16xf32>, vector<16x8xf32>, vector<16x8xf32> -> vector<16x8xf32>
    %47 = arith.maximumf %45, %46 : vector<16x8xf32>
    %48 = tpu.iota {dimensions = array<i32: 0>} : vector<8x12xi32>
    %49 = tpu.iota {dimensions = array<i32: 1>} : vector<8x12xi32>
    %c2_i32_14 = arith.constant 2 : i32
    %50 = vector.broadcast %c2_i32_14 : i32 to vector<8x12xi32>
    %51 = arith.subi %49, %50 : vector<8x12xi32>
    %52 = arith.cmpi eq, %51, %48 : vector<8x12xi32>
    %53 = arith.extui %52 : vector<8x12xi1> to vector<8x12xi32>
    %54 = arith.sitofp %53 : vector<8x12xi32> to vector<8x12xf32>
    %cst_15 = arith.constant dense<0.000000e+00> : vector<16x12xf32>
    %55 = tpu.matmul %47, %54, %cst_15 {dimension_numbers = #tpu.dot_dimension_numbers<[1], [0], [0], [1], [0, 0, 1, 1], [], []>} : vector<16x8xf32>, vector<8x12xf32>, vector<16x12xf32> -> vector<16x12xf32>
    %56 = vector.extract_strided_slice %55 {offsets = [0, 0], sizes = [16, 8], strides = [1, 1]} : vector<16x12xf32> to vector<16x8xf32>
    %57 = vector.extract_strided_slice %55 {offsets = [0, 1], sizes = [16, 8], strides = [1, 1]} : vector<16x12xf32> to vector<16x8xf32>
    %58 = vector.extract_strided_slice %55 {offsets = [0, 2], sizes = [16, 8], strides = [1, 1]} : vector<16x12xf32> to vector<16x8xf32>
    %59 = vector.extract_strided_slice %55 {offsets = [0, 3], sizes = [16, 8], strides = [1, 1]} : vector<16x12xf32> to vector<16x8xf32>
    %60 = vector.extract_strided_slice %55 {offsets = [0, 4], sizes = [16, 8], strides = [1, 1]} : vector<16x12xf32> to vector<16x8xf32>
    %61 = tpu.concatenate %56, %57, %58, %59, %60 in 0 : vector<16x8xf32>, vector<16x8xf32>, vector<16x8xf32>, vector<16x8xf32>, vector<16x8xf32> -> vector<80x8xf32>
    %c0_16 = arith.constant 0 : index
    %c0_17 = arith.constant 0 : index
    %62 = vector.load %arg4[%c0_16, %c0_17] : memref<32x80xbf16, #tpu.memory_space<vmem>>, vector<32x80xbf16>
    %63 = arith.truncf %61 : vector<80x8xf32> to vector<80x8xbf16>
    %cst_18 = arith.constant dense<0.000000e+00> : vector<32x8xf32>
    %64 = tpu.matmul %62, %63, %cst_18 {dimension_numbers = #tpu.dot_dimension_numbers<[1], [0], [0], [1], [0, 0, 1, 1], [], []>} : vector<32x80xbf16>, vector<80x8xbf16>, vector<32x8xf32> -> vector<32x8xf32>
    %c0_19 = arith.constant 0 : index
    %c0_20 = arith.constant 0 : index
    %65 = vector.load %arg5[%c0_19, %c0_20] : memref<32x1xf32, #tpu.memory_space<vmem>>, vector<32x1xf32>
    %66 = vector.broadcast %65 : vector<32x1xf32> to vector<32x8xf32>
    %67 = arith.addf %64, %66 : vector<32x8xf32>
    %cst_21 = arith.constant 0.000000e+00 : f32
    %68 = vector.broadcast %cst_21 : f32 to vector<32x8xf32>
    %69 = arith.maximumf %67, %68 : vector<32x8xf32>
    %cst_22 = arith.constant dense<0xFF800000> : vector<32xf32>
    %70 = vector.multi_reduction <maximumf>, %69, %cst_22 [1] : vector<32x8xf32> to vector<32xf32>
    %71 = vector.shape_cast %70 : vector<32xf32> to vector<32x1xf32>
    %cst_23 = arith.constant 9.99999974E-6 : f32
    %72 = vector.broadcast %cst_23 : f32 to vector<32x1xf32>
    %73 = arith.addf %71, %72 : vector<32x1xf32>
    %74 = tpu.reciprocal %73 {approx = true} : vector<32x1xf32> -> vector<32x1xf32>
    %75 = vector.broadcast %74 : vector<32x1xf32> to vector<32x8xf32>
    %76 = arith.mulf %69, %75 : vector<32x8xf32>
    %77 = tpu.iota {dimensions = array<i32: 0>} : vector<8x4xi32>
    %78 = tpu.iota {dimensions = array<i32: 1>} : vector<8x4xi32>
    %c2_i32_24 = arith.constant 2 : i32
    %79 = vector.broadcast %c2_i32_24 : i32 to vector<8x4xi32>
    %80 = arith.muli %79, %78 : vector<8x4xi32>
    %81 = arith.cmpi eq, %77, %80 : vector<8x4xi32>
    %82 = arith.extui %81 : vector<8x4xi1> to vector<8x4xi32>
    %83 = arith.sitofp %82 : vector<8x4xi32> to vector<8x4xf32>
    %c2_i32_25 = arith.constant 2 : i32
    %84 = vector.broadcast %c2_i32_25 : i32 to vector<8x4xi32>
    %85 = arith.muli %84, %78 : vector<8x4xi32>
    %c1_i32_26 = arith.constant 1 : i32
    %86 = vector.broadcast %c1_i32_26 : i32 to vector<8x4xi32>
    %87 = arith.addi %85, %86 : vector<8x4xi32>
    %88 = arith.cmpi eq, %77, %87 : vector<8x4xi32>
    %89 = arith.extui %88 : vector<8x4xi1> to vector<8x4xi32>
    %90 = arith.sitofp %89 : vector<8x4xi32> to vector<8x4xf32>
    %cst_27 = arith.constant dense<0.000000e+00> : vector<32x4xf32>
    %91 = tpu.matmul %76, %83, %cst_27 {dimension_numbers = #tpu.dot_dimension_numbers<[1], [0], [0], [1], [0, 0, 1, 1], [], []>} : vector<32x8xf32>, vector<8x4xf32>, vector<32x4xf32> -> vector<32x4xf32>
    %cst_28 = arith.constant dense<0.000000e+00> : vector<32x4xf32>
    %92 = tpu.matmul %76, %90, %cst_28 {dimension_numbers = #tpu.dot_dimension_numbers<[1], [0], [0], [1], [0, 0, 1, 1], [], []>} : vector<32x8xf32>, vector<8x4xf32>, vector<32x4xf32> -> vector<32x4xf32>
    %93 = arith.maximumf %91, %92 : vector<32x4xf32>
    %94 = tpu.iota {dimensions = array<i32: 0>} : vector<4x12xi32>
    %95 = tpu.iota {dimensions = array<i32: 1>} : vector<4x12xi32>
    %c2_i32_29 = arith.constant 2 : i32
    %96 = vector.broadcast %c2_i32_29 : i32 to vector<4x12xi32>
    %97 = arith.subi %95, %96 : vector<4x12xi32>
    %c2_i32_30 = arith.constant 2 : i32
    %98 = vector.broadcast %c2_i32_30 : i32 to vector<4x12xi32>
    %99 = arith.muli %98, %94 : vector<4x12xi32>
    %100 = arith.cmpi eq, %97, %99 : vector<4x12xi32>
    %c2_i32_31 = arith.constant 2 : i32
    %101 = vector.broadcast %c2_i32_31 : i32 to vector<4x12xi32>
    %102 = arith.muli %101, %94 : vector<4x12xi32>
    %c1_i32_32 = arith.constant 1 : i32
    %103 = vector.broadcast %c1_i32_32 : i32 to vector<4x12xi32>
    %104 = arith.addi %102, %103 : vector<4x12xi32>
    %105 = arith.cmpi eq, %97, %104 : vector<4x12xi32>
    %106 = arith.ori %100, %105 : vector<4x12xi1>
    %107 = arith.extui %106 : vector<4x12xi1> to vector<4x12xi32>
    %108 = arith.sitofp %107 : vector<4x12xi32> to vector<4x12xf32>
    %cst_33 = arith.constant dense<0.000000e+00> : vector<32x12xf32>
    %109 = tpu.matmul %93, %108, %cst_33 {dimension_numbers = #tpu.dot_dimension_numbers<[1], [0], [0], [1], [0, 0, 1, 1], [], []>} : vector<32x4xf32>, vector<4x12xf32>, vector<32x12xf32> -> vector<32x12xf32>
    %110 = vector.extract_strided_slice %109 {offsets = [0, 0], sizes = [32, 8], strides = [1, 1]} : vector<32x12xf32> to vector<32x8xf32>
    %111 = vector.extract_strided_slice %109 {offsets = [0, 1], sizes = [32, 8], strides = [1, 1]} : vector<32x12xf32> to vector<32x8xf32>
    %112 = vector.extract_strided_slice %109 {offsets = [0, 2], sizes = [32, 8], strides = [1, 1]} : vector<32x12xf32> to vector<32x8xf32>
    %113 = vector.extract_strided_slice %109 {offsets = [0, 3], sizes = [32, 8], strides = [1, 1]} : vector<32x12xf32> to vector<32x8xf32>
    %114 = vector.extract_strided_slice %109 {offsets = [0, 4], sizes = [32, 8], strides = [1, 1]} : vector<32x12xf32> to vector<32x8xf32>
    %115 = tpu.concatenate %110, %111, %112, %113, %114 in 0 : vector<32x8xf32>, vector<32x8xf32>, vector<32x8xf32>, vector<32x8xf32>, vector<32x8xf32> -> vector<160x8xf32>
    %c0_34 = arith.constant 0 : index
    %c0_35 = arith.constant 0 : index
    %116 = vector.load %arg6[%c0_34, %c0_35] : memref<32x160xbf16, #tpu.memory_space<vmem>>, vector<32x160xbf16>
    %117 = arith.truncf %115 : vector<160x8xf32> to vector<160x8xbf16>
    %cst_36 = arith.constant dense<0.000000e+00> : vector<32x8xf32>
    %118 = tpu.matmul %116, %117, %cst_36 {dimension_numbers = #tpu.dot_dimension_numbers<[1], [0], [0], [1], [0, 0, 1, 1], [], []>} : vector<32x160xbf16>, vector<160x8xbf16>, vector<32x8xf32> -> vector<32x8xf32>
    %c0_37 = arith.constant 0 : index
    %c0_38 = arith.constant 0 : index
    %119 = vector.load %arg7[%c0_37, %c0_38] : memref<32x1xf32, #tpu.memory_space<vmem>>, vector<32x1xf32>
    %120 = vector.broadcast %119 : vector<32x1xf32> to vector<32x8xf32>
    %121 = arith.addf %118, %120 : vector<32x8xf32>
    %cst_39 = arith.constant 0.000000e+00 : f32
    %122 = vector.broadcast %cst_39 : f32 to vector<32x8xf32>
    %123 = arith.maximumf %121, %122 : vector<32x8xf32>
    %cst_40 = arith.constant dense<0xFF800000> : vector<32xf32>
    %124 = vector.multi_reduction <maximumf>, %123, %cst_40 [1] : vector<32x8xf32> to vector<32xf32>
    %125 = vector.shape_cast %124 : vector<32xf32> to vector<32x1xf32>
    %cst_41 = arith.constant 9.99999974E-6 : f32
    %126 = vector.broadcast %cst_41 : f32 to vector<32x1xf32>
    %127 = arith.addf %125, %126 : vector<32x1xf32>
    %128 = tpu.reciprocal %127 {approx = true} : vector<32x1xf32> -> vector<32x1xf32>
    %129 = vector.broadcast %128 : vector<32x1xf32> to vector<32x8xf32>
    %130 = arith.mulf %123, %129 : vector<32x8xf32>
    %131 = tpu.iota {dimensions = array<i32: 0>} : vector<8x20xi32>
    %132 = tpu.iota {dimensions = array<i32: 1>} : vector<8x20xi32>
    %c2_i32_42 = arith.constant 2 : i32
    %133 = vector.broadcast %c2_i32_42 : i32 to vector<8x20xi32>
    %134 = arith.subi %132, %133 : vector<8x20xi32>
    %c2_i32_43 = arith.constant 2 : i32
    %135 = vector.broadcast %c2_i32_43 : i32 to vector<8x20xi32>
    %136 = arith.muli %135, %131 : vector<8x20xi32>
    %137 = arith.cmpi eq, %134, %136 : vector<8x20xi32>
    %c2_i32_44 = arith.constant 2 : i32
    %138 = vector.broadcast %c2_i32_44 : i32 to vector<8x20xi32>
    %139 = arith.muli %138, %131 : vector<8x20xi32>
    %c1_i32_45 = arith.constant 1 : i32
    %140 = vector.broadcast %c1_i32_45 : i32 to vector<8x20xi32>
    %141 = arith.addi %139, %140 : vector<8x20xi32>
    %142 = arith.cmpi eq, %134, %141 : vector<8x20xi32>
    %143 = arith.ori %137, %142 : vector<8x20xi1>
    %144 = arith.extui %143 : vector<8x20xi1> to vector<8x20xi32>
    %145 = arith.sitofp %144 : vector<8x20xi32> to vector<8x20xf32>
    %cst_46 = arith.constant dense<0.000000e+00> : vector<32x20xf32>
    %146 = tpu.matmul %130, %145, %cst_46 {dimension_numbers = #tpu.dot_dimension_numbers<[1], [0], [0], [1], [0, 0, 1, 1], [], []>} : vector<32x8xf32>, vector<8x20xf32>, vector<32x20xf32> -> vector<32x20xf32>
    %147 = vector.extract_strided_slice %146 {offsets = [0, 0], sizes = [32, 16], strides = [1, 1]} : vector<32x20xf32> to vector<32x16xf32>
    %148 = vector.extract_strided_slice %146 {offsets = [0, 1], sizes = [32, 16], strides = [1, 1]} : vector<32x20xf32> to vector<32x16xf32>
    %149 = vector.extract_strided_slice %146 {offsets = [0, 2], sizes = [32, 16], strides = [1, 1]} : vector<32x20xf32> to vector<32x16xf32>
    %150 = vector.extract_strided_slice %146 {offsets = [0, 3], sizes = [32, 16], strides = [1, 1]} : vector<32x20xf32> to vector<32x16xf32>
    %151 = vector.extract_strided_slice %146 {offsets = [0, 4], sizes = [32, 16], strides = [1, 1]} : vector<32x20xf32> to vector<32x16xf32>
    %152 = tpu.concatenate %147, %148, %149, %150, %151 in 0 : vector<32x16xf32>, vector<32x16xf32>, vector<32x16xf32>, vector<32x16xf32>, vector<32x16xf32> -> vector<160x16xf32>
    %c0_47 = arith.constant 0 : index
    %c0_48 = arith.constant 0 : index
    %153 = vector.load %arg8[%c0_47, %c0_48] : memref<16x160xbf16, #tpu.memory_space<vmem>>, vector<16x160xbf16>
    %154 = arith.truncf %152 : vector<160x16xf32> to vector<160x16xbf16>
    %cst_49 = arith.constant dense<0.000000e+00> : vector<16x16xf32>
    %155 = tpu.matmul %153, %154, %cst_49 {dimension_numbers = #tpu.dot_dimension_numbers<[1], [0], [0], [1], [0, 0, 1, 1], [], []>} : vector<16x160xbf16>, vector<160x16xbf16>, vector<16x16xf32> -> vector<16x16xf32>
    %c0_50 = arith.constant 0 : index
    %c0_51 = arith.constant 0 : index
    %156 = vector.load %arg9[%c0_50, %c0_51] : memref<16x1xf32, #tpu.memory_space<vmem>>, vector<16x1xf32>
    %157 = vector.broadcast %156 : vector<16x1xf32> to vector<16x16xf32>
    %158 = arith.addf %155, %157 : vector<16x16xf32>
    %cst_52 = arith.constant 0.000000e+00 : f32
    %159 = vector.broadcast %cst_52 : f32 to vector<16x16xf32>
    %160 = arith.maximumf %158, %159 : vector<16x16xf32>
    %cst_53 = arith.constant dense<0xFF800000> : vector<16xf32>
    %161 = vector.multi_reduction <maximumf>, %160, %cst_53 [1] : vector<16x16xf32> to vector<16xf32>
    %162 = vector.shape_cast %161 : vector<16xf32> to vector<16x1xf32>
    %cst_54 = arith.constant 9.99999974E-6 : f32
    %163 = vector.broadcast %cst_54 : f32 to vector<16x1xf32>
    %164 = arith.addf %162, %163 : vector<16x1xf32>
    %165 = tpu.reciprocal %164 {approx = true} : vector<16x1xf32> -> vector<16x1xf32>
    %166 = vector.broadcast %165 : vector<16x1xf32> to vector<16x16xf32>
    %167 = arith.mulf %160, %166 : vector<16x16xf32>
    %c0_55 = arith.constant 0 : index
    %c0_56 = arith.constant 0 : index
    %168 = vector.load %arg10[%c0_55, %c0_56] : memref<4x16xbf16, #tpu.memory_space<vmem>>, vector<4x16xbf16>
    %169 = arith.truncf %167 : vector<16x16xf32> to vector<16x16xbf16>
    %cst_57 = arith.constant dense<0.000000e+00> : vector<4x16xf32>
    %170 = tpu.matmul %168, %169, %cst_57 {dimension_numbers = #tpu.dot_dimension_numbers<[1], [0], [0], [1], [0, 0, 1, 1], [], []>} : vector<4x16xbf16>, vector<16x16xbf16>, vector<4x16xf32> -> vector<4x16xf32>
    %c0_58 = arith.constant 0 : index
    %c0_59 = arith.constant 0 : index
    %171 = vector.load %arg11[%c0_58, %c0_59] : memref<4x1xf32, #tpu.memory_space<vmem>>, vector<4x1xf32>
    %172 = vector.broadcast %171 : vector<4x1xf32> to vector<4x16xf32>
    %173 = arith.addf %170, %172 : vector<4x16xf32>
    %cst_60 = arith.constant dense<0xFF800000> : vector<16xf32>
    %174 = vector.multi_reduction <maximumf>, %173, %cst_60 [0] : vector<4x16xf32> to vector<16xf32>
    %175 = vector.shape_cast %174 : vector<16xf32> to vector<1x16xf32>
    %176 = vector.broadcast %175 : vector<1x16xf32> to vector<4x16xf32>
    %177 = arith.subf %173, %176 : vector<4x16xf32>
    %178 = math.exp %177 : vector<4x16xf32>
    %cst_61 = arith.constant dense<0.000000e+00> : vector<16xf32>
    %179 = vector.multi_reduction <add>, %178, %cst_61 [0] : vector<4x16xf32> to vector<16xf32>
    %180 = vector.shape_cast %179 : vector<16xf32> to vector<1x16xf32>
    %181 = tpu.reciprocal %180 {approx = true} : vector<1x16xf32> -> vector<1x16xf32>
    %182 = vector.broadcast %181 : vector<1x16xf32> to vector<4x16xf32>
    %183 = arith.mulf %178, %182 : vector<4x16xf32>
    %c0_62 = arith.constant 0 : index
    %c0_63 = arith.constant 0 : index
    %c0_64 = arith.constant 0 : index
    %184 = vector.load %arg12[%c0_62, %c0_63, %c0_64] : memref<1x4x16xf32, #tpu.memory_space<vmem>>, vector<1x4x16xf32>
    %185 = vector.shape_cast %184 : vector<1x4x16xf32> to vector<4x16xf32>
    %186 = vector.shape_cast %183 : vector<4x16xf32> to vector<1x4x16xf32>
    tpu.vector_store %arg12[%c0_62, %c0_63, %c0_64], %186 {strides = array<i32>} : memref<1x4x16xf32, #tpu.memory_space<vmem>>, vector<1x4x16xf32>,
    return
  }
  func.func @transform_0(%arg0: i32) -> (i32, i32, i32) {
    %c0_i32 = arith.constant 0 : i32
    %c0_i32_0 = arith.constant 0 : i32
    %c0_i32_1 = arith.constant 0 : i32
    return %arg0, %c0_i32, %c0_i32_0 : i32, i32, i32
  }
  func.func @transform_1(%arg0: i32) -> (i32, i32) {
    %c0_i32 = arith.constant 0 : i32
    %c0_i32_0 = arith.constant 0 : i32
    %c0_i32_1 = arith.constant 0 : i32
    return %c0_i32, %c0_i32_0 : i32, i32
  }
  func.func @transform_2(%arg0: i32) -> (i32, i32) {
    %c0_i32 = arith.constant 0 : i32
    %c0_i32_0 = arith.constant 0 : i32
    %c0_i32_1 = arith.constant 0 : i32
    return %c0_i32, %c0_i32_0 : i32, i32
  }
  func.func @transform_3(%arg0: i32) -> (i32, i32) {
    %c0_i32 = arith.constant 0 : i32
    %c0_i32_0 = arith.constant 0 : i32
    %c0_i32_1 = arith.constant 0 : i32
    return %c0_i32, %c0_i32_0 : i32, i32
  }
  func.func @transform_4(%arg0: i32) -> (i32, i32) {
    %c0_i32 = arith.constant 0 : i32
    %c0_i32_0 = arith.constant 0 : i32
    %c0_i32_1 = arith.constant 0 : i32
    return %c0_i32, %c0_i32_0 : i32, i32
  }
  func.func @transform_5(%arg0: i32) -> (i32, i32) {
    %c0_i32 = arith.constant 0 : i32
    %c0_i32_0 = arith.constant 0 : i32
    %c0_i32_1 = arith.constant 0 : i32
    return %c0_i32, %c0_i32_0 : i32, i32
  }
  func.func @transform_6(%arg0: i32) -> (i32, i32) {
    %c0_i32 = arith.constant 0 : i32
    %c0_i32_0 = arith.constant 0 : i32
    %c0_i32_1 = arith.constant 0 : i32
    return %c0_i32, %c0_i32_0 : i32, i32
  }
  func.func @transform_7(%arg0: i32) -> (i32, i32) {
    %c0_i32 = arith.constant 0 : i32
    %c0_i32_0 = arith.constant 0 : i32
    %c0_i32_1 = arith.constant 0 : i32
    return %c0_i32, %c0_i32_0 : i32, i32
  }
  func.func @transform_8(%arg0: i32) -> (i32, i32) {
    %c0_i32 = arith.constant 0 : i32
    %c0_i32_0 = arith.constant 0 : i32
    %c0_i32_1 = arith.constant 0 : i32
    return %c0_i32, %c0_i32_0 : i32, i32
  }
  func.func @transform_9(%arg0: i32) -> (i32, i32) {
    %c0_i32 = arith.constant 0 : i32
    %c0_i32_0 = arith.constant 0 : i32
    %c0_i32_1 = arith.constant 0 : i32
    return %c0_i32, %c0_i32_0 : i32, i32
  }
  func.func @transform_10(%arg0: i32) -> (i32, i32) {
    %c0_i32 = arith.constant 0 : i32
    %c0_i32_0 = arith.constant 0 : i32
    %c0_i32_1 = arith.constant 0 : i32
    return %c0_i32, %c0_i32_0 : i32, i32
  }
  func.func @transform_11(%arg0: i32) -> (i32, i32, i32) {
    %c0_i32 = arith.constant 0 : i32
    %c0_i32_0 = arith.constant 0 : i32
    %c0_i32_1 = arith.constant 0 : i32
    return %arg0, %c0_i32, %c0_i32_0 : i32, i32, i32
  }
}

</mosaic_0001>

<bundles_post_ra>
// kernel: ed_tcn_forward.1
= control target key start
LH: loop header
LB: loop body
LE: loop exit
PB: predicated region body
PF: predicated region fallthrough
CT: control target
= control target key end

     0   :  { %s2728_s0 = inlined_call_operand.vmem [shape: f32[2,8,16], index: 0, kind: input, shape index: {}]   ;;  %s2729_s1 = inlined_call_operand.vmem [shape: bf16[16,40], index: 1, kind: input, shape index: {}]   ;;  %s2730_s2 = inlined_call_operand.vmem [shape: f32[16,1], index: 2, kind: input, shape index: {}]   ;;  %s2731_s3 = inlined_call_operand.vmem [shape: bf16[32,80], index: 3, kind: input, shape index: {}]   ;;  %s2732_s4 = inlined_call_operand.vmem [shape: f32[32,1], index: 4, kind: input, shape index: {}]   ;;  %s2733_s5 = inlined_call_operand.vmem [shape: bf16[32,160], index: 5, kind: input, shape index: {}]   ;;  %s2734_s6 = inlined_call_operand.vmem [shape: f32[32,1], index: 6, kind: input, shape index: {}]   ;;  %s2735_s7 = inlined_call_operand.vmem [shape: bf16[16,160], index: 7, kind: input, shape index: {}]   ;;  %s2736_s8 = inlined_call_operand.vmem [shape: f32[16,1], index: 8, kind: input, shape index: {}]   ;;  %s2737_s9 = inlined_call_operand.vmem [shape: bf16[4,16], index: 9, kind: input, shape index: {}]   ;;  %s2738_s10 = inlined_call_operand.vmem [shape: f32[4,1], index: 10, kind: input, shape index: {}]   ;;  %s2739_s11 = inlined_call_operand.hbm [shape: f32[2,4,16], index: 11, kind: output, shape index: {}]  }
   0x1   :  { %2748 = sst [smem:[#allocation5_spill]] %s2728_s0 }
   0x2   :  { %16 = vsyncpa [#allocation3], 0 }
   0x3   :  { %18 = vsyncpa [#allocation3 + $0x1], 0  ;;  %s2386_s17 = smov 0   ;;  %s2388_s18 = smov 0  }
   0x4   :  { %s2390_s19 = smov 0   ;;  %s2392_s20 = smov 0  }
   0x5 LB: > { %s2407_s21 = sadd.s32 4294967295, %s2313_s20   ;;  %s1846_s22 = sadd.s32 4294967294, %s2313_s20   ;;  %s2313_s20 = sphi %s2392_s20, %s2761_s20   ;;  %s2309_s19 = sphi %s2390_s19, %s2760_s19   ;;  %s2305_s18 = sphi %s2388_s18, %s2759_s18   ;;  %s2301_s17 = sphi %s2386_s17, %s2758_s17  }
   0x6   : > { %s2411_s23 = sadd.s32 1, %s2313_s20   ;;  %s267_s24 = sadd.s32 1, %s2309_s19 }
   0x7   : > { %s264_s25 = ssub.s32 %s2313_s20, %s2411_s23  ;;  %p277_p0 = scmp.ne.s32.totalorder %s2309_s19, %s2305_s18 }
   0x8   : > { %p265_p1 = scmp.eq.s32.totalorder %s264_s25, 0  ;;  %p278_p2 = scmp.eq.s32.totalorder %s2407_s21, 1 }
   0x9   : > { %p283_p3 = scmp.ne.s32.totalorder %s2305_s18, %s2301_s17  ;;  %p284_p4 = scmp.eq.s32.totalorder %s1846_s22, 1 }
   0xa   : > { %s2422_s26 = scalar_select %p265_p1, %s2309_s19, %s267_s24  }
   0xb   : > { %p2424_p5 = por %p278_p2, %p277_p0  ;;  %p2428_p6 = por %p284_p4, %p283_p3 }
   0xc   : > { %p1849_p7 = scmp.ge.s32.totalorder %s2313_s20, 1  ;;  %p339_p8 = scmp.lt.s32.totalorder %s2313_s20, 3 }
   0xe   : > { %p340_p9 = pnand %p1849_p7, %p339_p8 }
   0xf   : > { %v384_v0 = vlaneseq (!%p340_p9)  ;;  %p378_p10 = scmp.lt.s32.totalorder (!%p340_p9), %s2407_s21, 1  ;;  %v2315_v1 = vmov (!%p340_p9), 0.0|0.0   ;;  %vm2316_vm0 = vmmov (!%p340_p9), 0   ;;  %v2317_v4 = vmov (!%p340_p9), 0.0   ;;  %s2751_s0 = sld [smem:[#allocation5_spill]] (!%p340_p9)  ;;  %v488_v12 = vld [vmem:[%s2730_s2] sm:$0xff] (!%p340_p9) }
  0x10   : > { %343 = sbr.rel (%p340_p9) target bundleno = 3689 (0xe69), region = 64  ;;  %2049 = vmatprep.subr.bf16.mxu0 (!%p340_p9), %v2315_v1  ;;  %1965 = vmatprep.mubr.msk.f32.mxu0 (!%p340_p9), %vm2316_vm0, %v2317_v4  ;;  %v2318_v7 = vmov (!%p340_p9), 1.0|1.0   ;;  %vm396_vm4 = vcmask (!%p340_p9), 130048   ;;  %s2740_s15 = smov (!%p340_p9), 125   ;;  %v2321_v11 = vmov (!%p340_p9), 0  }
  0x11   : > { %v2435_v2 = vshrl.u32 (!%p340_p9), %v384_v0, 7  ;;  %v2437_v3 = vand.u32 (!%p340_p9), 127, %v384_v0  ;;  %1968 = vmatprep.subr.bf16.mxu1 (!%p340_p9), %v2317_v4  ;;  %1974 = vmatprep.mubr.msk.bf16.mxu1 (!%p340_p9), %vm2316_vm0, %v2317_v4  ;;  %s2746_s16 = smov (!%p340_p9), 127   ;;  %s2744_s22 = smov (!%p340_p9), 124   ;;  %v489_v13 = vld [vmem:[%s2730_s2 + $0x8] sm:$0xff] (!%p340_p9)  ;;  %vm509_vm5 = vcmask (!%p340_p9), 1043456  }
  0x12   : > { %2109 = vset.pattern.permute.xlu0 (!%p340_p9), %v2321_v11  ;;  %2110 = vset.pattern.permute.xlu1 (!%p340_p9), %v2321_v11  ;;  %s2742_s24 = smov (!%p340_p9), 126   ;;  %v2211_v22 = vld [vmem:[%s2729_s1] sm:$0xff] (!%p340_p9)   ;;  %vm505_vm6 = vcmask (!%p340_p9), 326656   ;;  %v2324_v45 = vmov (!%p340_p9), 1.0   ;;  %vm740_vm13 = vcmask (!%p340_p9), 64512   ;;  %vm891_vm14 = vcmask (!%p340_p9), 654336  }
  0x13   : > { %v2446_v5 = vadd.s32 (!%p340_p9), 8, %v2435_v2  ;;  %v2449_v6 = vadd.s32 (!%p340_p9), 4294967294, %v2437_v3  ;;  %v568_v35 = vmul.u32 (!%p340_p9), 2, %v2437_v3  ;;  %v2212_v56 = vld [vmem:[%s2731_s3] sm:$0xff] (!%p340_p9)   ;;  %v858_v58 = vld [vmem:[%s2732_s4 + $0x8] sm:$0xff] (!%p340_p9)  ;;  %v859_v59 = vld [vmem:[%s2732_s4 + $0x10] sm:$0xff] (!%p340_p9) }
  0x14   : > { %v857_v57 = vld [vmem:[%s2732_s4] sm:$0xff] (!%p340_p9)  ;;  %v860_v60 = vld [vmem:[%s2732_s4 + $0x18] sm:$0xff] (!%p340_p9)  ;;  %s2757_s12 = smov (!%p340_p9), 127  }
  0x15   : > { %vm390_vm1 = vcmp.eq.s32.totalorder (!%p340_p9), %v2449_v6, %v2435_v2  ;;  %vm391_vm2 = vcmp.eq.s32.totalorder (!%p340_p9), %v2449_v6, %v2446_v5  ;;  %vm569_vm7 = vcmp.eq.s32.totalorder (!%p340_p9), %v2435_v2, %v568_v35  ;;  %vm570_vm8 = vcmp.eq.s32.totalorder (!%p340_p9), %v2446_v5, %v568_v35 }
  0x16   : > { %vm2050_vm3 = vmpackc.low (!%p340_p9), %vm391_vm2, %vm390_vm1  ;;  %v2490_v36 = vadd.s32 (!%p340_p9), 1, %v568_v35 }
  0x17   : > { %s379_s29 = scalar_select %p378_p10, %s2407_s21, 1  ;;  %2051 = vmatpush3.bf16.msk.msra.mxu0 %vm2050_vm3, %v2318_v7  ;;  %vm2052_vm9 = vmpackc.low %vm570_vm8, %vm569_vm7  ;;  %vm1168_vm3 = vcmask 31744  }
  0x18   : > { %2053 = vmatprep.subr.msk.bf16.mxu0 %vm2052_vm9, %v2318_v7  ;;  %vm576_vm10 = vcmp.eq.s32.totalorder %v2435_v2, %v2490_v36  ;;  %vm577_vm11 = vcmp.eq.s32.totalorder %v2446_v5, %v2490_v36 }
  0x19   : > { %s1851_s30 = sshll.u32 %s379_s29, 3  ;;  %vm2056_vm12 = vmpackc.low %vm577_vm11, %vm576_vm10  ;;  %s2755_s29 = smov 125  }
  0x1a   : > { %s381_s14 = scalar_lea.vmem %s2751_s0, %s1851_s30  ;;  %s2756_s30 = smov 124  }
  0x1b   : > { %v383_v8 = vld [vmem:[%s381_s14] sm:$0xff]  ;;  %s375_s0 = sand.u32 1, %s2305_s18   ;;  %s1911_s14 = sshll.u32 %s2407_s21, 6 }
  0x1c   : > { %1966 = vmatmul.mubr.msk.f32.vlgmr.msra.gmra.mrb[0].mxu0 %vm396_vm4, %v383_v8  ;;  %s2325_s21 = smov [#allocation2]  }
  0x1d   : > { %2055 = vmatpush3.bf16.msk.msra.mxu0 %vm2052_vm9, %v2318_v7  ;;  %s2255_s13 = sshll.u32 %s2325_s21, 4  ;;  %s2256_s13 = int_to_ptr.vmem [resolvable:$false] %s2255_s13 }
  0x1e   : > { %2057 = vmatprep.subr.msk.bf16.mxu0 %vm2056_vm12, %v2318_v7 }
  0xef   : > { %v466_v9 = vpop.f32.mrb[0].mxu0 }
  0xf0   : > { %477 = vrot.lane.b32.xlu1 %v466_v9, %s2740_s15  ;;  %471 = vrot.lane.b32.xlu0 %v466_v9, %s2746_s16  ;;  %v1967_v10 = vpop.f32.mrb[1].mxu0 }
  0xf4   : > { %480 = vrot.lane.b32.xlu1 %v466_v9, %s2744_s22  ;;  %474 = vrot.lane.b32.xlu0 %v466_v9, %s2742_s24 }
  0xf8   : > { %492 = vperm.xlu0 %2109, %v488_v12   ;;  %497 = vperm.xlu1 %2110, %v489_v13  }
 0x162   : > { %v478_v14 = vpop.permute.xlu1 %477  ;;  %v472_v15 = vpop.permute.xlu0 %471 }
 0x163   : > { %v485_v16 = vpack.c.bf16 %v472_v15, %v466_v9 }
 0x165   : > { %1969 = vmatpush3.bf16.msra.mxu1 %v485_v16 }
 0x166   : > { %v481_v17 = vpop.permute.xlu1 %480  ;;  %v475_v18 = vpop.permute.xlu0 %474  ;;  %1970 = vmatprep.subr.bf16.mxu1 %v2317_v4 }
 0x167   : > { %v486_v19 = vpack.c.bf16 %v478_v14, %v475_v18  ;;  %v487_v20 = vpack.c.bf16 %v481_v17, %v481_v17  ;;  %v2213_v17 = vld [vmem:[%s2731_s3 + $0x8] sm:$0xff]  }
 0x169   : > { %1971 = vmatpush3.bf16.msra.mxu1 %v486_v19  ;;  %v511_v21 = vsel %vm509_vm5, %v487_v20, 0 }
 0x16a   : > { %1972 = vmatprep.subr.bf16.mxu1 %v2317_v4 }
 0x16d   : > { %1973 = vmatpush3.bf16.msra.mxu1 %v511_v21 }
 0x170   : > { %1975 = vmatmul.mubr.msk.bf16.vlgmr.msra.gmra.mrb[0].mxu1 %vm505_vm6, %v2211_v22 }
 0x171   : > { %2007 = vmatprep.mubr.msk.bf16.mxu1 %vm891_vm14, %v2212_v56  ;;  %v1161_v56 = vmul.u32 2, %v2435_v2 }
 0x173   : > { %vm1162_vm15 = vcmp.eq.s32.totalorder %v2449_v6, %v1161_v56 }
 0x177   : > { %v493_v23 = vpop.permute.xlu0 %492  ;;  %v498_v25 = vpop.permute.xlu1 %497 }
 0x243   : > { %v547_v24 = vpop.f32.mrb[0].mxu1 }
 0x244   : > { %v548_v26 = vadd.f32 %v547_v24, %v493_v23  ;;  %v1976_v27 = vpop.f32.mrb[1].mxu1 }
 0x245   : > { %v550_v28 = vpop.f32.mrb[2].mxu1 }
 0x246   : > { %v554_v29 = vmax.f32 %v548_v26, 0.0  ;;  %v551_v30 = vadd.f32 %v550_v28, %v498_v25  ;;  %v1977_v31 = vpop.f32.mrb[3].mxu1 }
 0x248   : > { %v555_v32 = vmax.f32 %v551_v30, 0.0  ;;  %v556_v33 = vsel %vm396_vm4, %v554_v29, -inf }
 0x249   : > { %557 = vmax.xlane.f32.xlu1 %v556_v33 }
 0x24a   : > { %v559_v34 = vsel %vm396_vm4, %v555_v32, -inf }
 0x24b   : > { %560 = vmax.xlane.f32.xlu0 %v559_v34 }
 0x2d6   : > { %v558_v37 = vpop.xlane.xlu1 %557 }
 0x2d7   : > { %v562_v38 = vadd.f32 1e-05, %v558_v37 }
 0x2d8   : > { %v561_v39 = vpop.xlane.xlu0 %560 }
 0x2d9   : > { %2223 = vrcp.f32 %v562_v38  ;;  %v563_v40 = vadd.f32 1e-05, %v561_v39 }
 0x2db   : > { %2225 = vrcp.f32 %v563_v40 }
 0x2e3   : > { %v2224_v41 = vpop.eup %2223 }
 0x2e4   : > { %v566_v42 = vmul.f32 %v2224_v41, %v554_v29 }
 0x2e5   : > { %v2226_v43 = vpop.eup %2225 }
 0x2e6   : > { %1982 = vmatprep.mubr.msk.f32.mxu0 %vm396_vm4, %v566_v42  ;;  %v567_v44 = vmul.f32 %v2226_v43, %v555_v32 }
 0x2e8   : > { %1983 = vmatmul.mubr.msk.f32.vlgmr.msra.gmra.mrb[2].mxu0 %vm396_vm4, %v567_v44 }
 0x2e9   : > { %2059 = vmatpush3.bf16.msk.msra.mxu0 %vm2056_vm12, %v2318_v7  ;;  %1989 = vmatprep.mubr.msk.f32.mxu0 %vm396_vm4, %v566_v42 }
 0x2ea   : > { %1992 = vmatprep.subr.msk.mxu0 %vm390_vm1, %v2324_v45 }
 0x2ec   : > { %1990 = vmatmul.mubr.msk.f32.vlgmr.msra.gmra.mrb[4].mxu0 %vm396_vm4, %v567_v44 }
 0x2ed   : > { %1993 = vmatpush3.msk.msra.mxu0 %vm390_vm1, %v2324_v45 }
 0x2ee   : > { %2011 = vmatprep.subr.msk.mxu0 %vm569_vm7, %v2324_v45 }
 0x3bb   : > { %v1984_v46 = vpop.f32.mrb[2].mxu0 }
 0x3bc   : > { %v654_v47 = vpop.f32.mrb[3].mxu0 }
 0x3bf   : > { %v1991_v48 = vpop.f32.mrb[4].mxu0 }
 0x3c0   : > { %v739_v49 = vmax.f32 %v1984_v46, %v1991_v48  ;;  %v729_v50 = vpop.f32.mrb[5].mxu0 }
 0x3c1   : > { %v738_v51 = vmax.f32 %v654_v47, %v729_v50 }
 0x3c3   : > { %1994 = vmatprep.mubr.msk.f32.mxu0 %vm740_vm13, %v738_v51 }
 0x3c4   : > { %1995 = vmatmul.mubr.msk.f32.vlgmr.msra.gmra.mrb[6].mxu0 %vm740_vm13, %v739_v49 }
 0x3c5   : > { %2012 = vmatpush3.msk.msra.mxu0 %vm569_vm7, %v2324_v45 }
 0x3c6   : > { %2019 = vmatprep.subr.msk.mxu0 %vm576_vm10, %v2324_v45 }
 0x497   : > { %v1996_v52 = vpop.f32.mrb[6].mxu0 }
 0x498   : > { %v813_v53 = vpop.f32.mrb[7].mxu0 }
 0x499   : > { %v2116_v54 = vpack.i.bf16 %v1996_v52, %v813_v53  ;;  %v852_v55 = vpack.c.bf16 %v1996_v52, %v813_v53 }
 0x49b   : > { %2117 = vrot.lane.b32.xlu1 %v2116_v54, %s2742_s24  ;;  %2112 = vrot.lane.b32.xlu0 %v2116_v54, %s2746_s16  ;;  %s2754_s24 = smov 126  }
 0x49c   : > { %1997 = vmatprep.subr.bf16.mxu1 %v852_v55 }
 0x49d   : > { %1998 = vmatpush3.bf16.msra.mxu1 %v852_v55 }
 0x49f   : > { %2122 = vrot.lane.b32.xlu1 %v2116_v54, %s2740_s15  ;;  %2127 = vrot.lane.b32.xlu0 %v2116_v54, %s2744_s22  ;;  %s1774_s22 = scalar_lea.sflag [#allocation3], %s375_s0 }
 0x4a3   : > { %863 = vperm.xlu1 %2110, %v857_v57   ;;  %868 = vperm.xlu0 %2109, %v858_v58   ;;  %v1163_v57 = vadd.s32 1, %v1161_v56  ;;  %v2217_v56 = vld [vmem:[%s2733_s5 + $0x14] ss:$8 sps:$4 sm:$0xff]  }
 0x4a5   : > { %vm1164_vm1 = vcmp.eq.s32.totalorder %v2449_v6, %v1163_v57  ;;  %v2219_v57 = vld [vmem:[%s2733_s5 + $0x10] ss:$8 sps:$4 sm:$0xff]  }
 0x4a6   : > { %vm2569_vm2 = vmor %vm1162_vm15, %vm1164_vm1 }
 0x4a7   : > { %873 = vperm.xlu1 %2110, %v859_v59   ;;  %878 = vperm.xlu0 %2109, %v860_v60   ;;  %v1889_v58 = vsel %vm2569_vm2, 1.0, %v2317_v4 }
 0x50d   : > { %v2118_v61 = vpop.permute.xlu1 %2117  ;;  %v2113_v62 = vpop.permute.xlu0 %2112 }
 0x50e   : > { %v2120_v63 = vunpack.i.h.bf16 %v2118_v61  ;;  %v2119_v0 = vunpack.i.l.bf16 %v2118_v61  ;;  %v2115_v1 = vunpack.i.h.bf16 %v2113_v62  ;;  %v2114_v3 = vunpack.i.l.bf16 %v2113_v62 }
 0x510   : > { %v853_v5 = vpack.c.bf16 %v2115_v1, %v2114_v3  ;;  %v854_v8 = vpack.c.bf16 %v2120_v63, %v2119_v0 }
 0x511   : > { %v2123_v7 = vpop.permute.xlu1 %2122  ;;  %v2128_v12 = vpop.permute.xlu0 %2127 }
 0x512   : > { %v2125_v9 = vunpack.i.h.bf16 %v2123_v7  ;;  %v2124_v10 = vunpack.i.l.bf16 %v2123_v7  ;;  %1999 = vmatprep.subr.bf16.mxu1 %v853_v5  ;;  %v2130_v14 = vunpack.i.h.bf16 %v2128_v12  ;;  %v2129_v15 = vunpack.i.l.bf16 %v2128_v12 }
 0x513   : > { %2000 = vmatpush3.bf16.msra.mxu1 %v853_v5 }
 0x514   : > { %2001 = vmatprep.subr.bf16.mxu1 %v854_v8  ;;  %v855_v13 = vpack.c.bf16 %v2125_v9, %v2124_v10  ;;  %v856_v16 = vpack.c.bf16 %v2130_v14, %v2129_v15 }
 0x517   : > { %2002 = vmatpush3.bf16.msra.mxu1 %v854_v8 }
 0x518   : > { %2003 = vmatprep.subr.bf16.mxu1 %v855_v13 }
 0x51b   : > { %2004 = vmatpush3.bf16.msra.mxu1 %v855_v13 }
 0x51c   : > { %2005 = vmatprep.subr.bf16.mxu1 %v856_v16 }
 0x51f   : > { %2006 = vmatpush3.bf16.msra.mxu1 %v856_v16 }
 0x520   : > { %1384 = vmatprep.subr.bf16.mxu1 %v2321_v11 }
 0x522   : > { %2008 = vmatmul.mubr.msk.bf16.vlgmr.msra.gmra.mrb[4].mxu1 %vm891_vm14, %v2213_v17  ;;  %v869_v18 = vpop.permute.xlu0 %868  ;;  %v864_v19 = vpop.permute.xlu1 %863  ;;  %v1338_v17 = vld [vmem:[%s2734_s6 + $0x18] sm:$0xff] }
 0x526   : > { %v879_v22 = vpop.permute.xlu0 %878  ;;  %v874_v25 = vpop.permute.xlu1 %873 }
 0x5f5   : > { %v2009_v20 = vpop.f32.mrb[4].mxu1 }
 0x5f6   : > { %v932_v21 = vpop.f32.mrb[5].mxu1  ;;  %v941_v28 = vadd.f32 %v2009_v20, %v874_v25  ;;  %v1337_v20 = vld [vmem:[%s2734_s6 + $0x10] sm:$0xff] }
 0x5f7   : > { %v933_v23 = vadd.f32 %v932_v21, %v864_v19  ;;  %v2010_v24 = vpop.f32.mrb[6].mxu1  ;;  %v2214_v19 = vld [vmem:[%s2733_s5 + $0x4] ss:$8 sps:$4 sm:$0xff]  }
 0x5f8   : > { %v944_v26 = vadd.f32 %v2010_v24, %v879_v22  ;;  %v935_v27 = vpop.f32.mrb[7].mxu1  ;;  %v949_v34 = vmax.f32 %v941_v28, 0.0 }
 0x5f9   : > { %v947_v29 = vmax.f32 %v933_v23, 0.0  ;;  %v936_v30 = vadd.f32 %v935_v27, %v869_v18  ;;  %v1335_v18 = vld [vmem:[%s2734_s6] sm:$0xff] }
 0x5fa   : > { %v950_v31 = vmax.f32 %v944_v26, 0.0  ;;  %v957_v38 = vsel %vm740_vm13, %v949_v34, -inf }
 0x5fb   : > { %v948_v32 = vmax.f32 %v936_v30, 0.0  ;;  %v951_v33 = vsel %vm740_vm13, %v947_v29, -inf }
 0x5fc   : > { %952 = vmax.xlane.f32.xlu1 %v951_v33  ;;  %v960_v37 = vsel %vm740_vm13, %v950_v31, -inf }
 0x5fd   : > { %v954_v35 = vsel %vm740_vm13, %v948_v32, -inf }
 0x5fe   : > { %955 = vmax.xlane.f32.xlu0 %v954_v35 }
 0x600   : > { %961 = vmax.xlane.f32.xlu1 %v960_v37 }
 0x602   : > { %958 = vmax.xlane.f32.xlu0 %v957_v38 }
 0x689   : > { %v953_v39 = vpop.xlane.xlu1 %952 }
 0x68a   : > { %v963_v40 = vadd.f32 1e-05, %v953_v39 }
 0x68b   : > { %v956_v41 = vpop.xlane.xlu0 %955 }
 0x68c   : > { %2227 = vrcp.f32 %v963_v40  ;;  %v964_v42 = vadd.f32 1e-05, %v956_v41 }
 0x68d   : > { %v962_v43 = vpop.xlane.xlu1 %961 }
 0x68e   : > { %2229 = vrcp.f32 %v964_v42  ;;  %v966_v44 = vadd.f32 1e-05, %v962_v43 }
 0x68f   : > { %v959_v46 = vpop.xlane.xlu0 %958 }
 0x690   : > { %v965_v47 = vadd.f32 1e-05, %v959_v46  ;;  %2231 = vrcp.f32 %v966_v44 }
 0x692   : > { %2233 = vrcp.f32 %v965_v47 }
 0x696   : > { %v2228_v48 = vpop.eup %2227 }
 0x697   : > { %v971_v49 = vmul.f32 %v2228_v48, %v947_v29 }
 0x698   : > { %v2230_v50 = vpop.eup %2229 }
 0x699   : > { %2013 = vmatprep.mubr.msk.f32.mxu0 %vm740_vm13, %v971_v49  ;;  %v972_v51 = vmul.f32 %v2230_v50, %v948_v32 }
 0x69a   : > { %v2232_v52 = vpop.eup %2231 }
 0x69b   : > { %2014 = vmatmul.mubr.msk.f32.vlgmr.msra.gmra.mrb[8].mxu0 %vm740_vm13, %v972_v51  ;;  %v974_v55 = vmul.f32 %v2232_v52, %v950_v31 }
 0x69c   : > { %v2234_v53 = vpop.eup %2233  ;;  %2020 = vmatpush3.msk.msra.mxu0 %vm576_vm10, %v2324_v45 }
 0x69d   : > { %v973_v54 = vmul.f32 %v2234_v53, %v949_v34  ;;  %2027 = vmatprep.subr.msk.mxu0 %vm509_vm5, %v1889_v58 }
 0x69f   : > { %2016 = vmatprep.mubr.msk.f32.mxu0 %vm740_vm13, %v973_v54 }
 0x6a0   : > { %2017 = vmatmul.mubr.msk.f32.gmra.mrb[10].mxu0 %vm740_vm13, %v974_v55 }
 0x6a1   : > { %2021 = vmatprep.mubr.msk.f32.mxu0 %vm740_vm13, %v971_v49 }
 0x6a4   : > { %2022 = vmatmul.mubr.msk.f32.vlgmr.msra.gmra.mrb[12].mxu0 %vm740_vm13, %v972_v51 }
 0x6a5   : > { %2024 = vmatprep.mubr.msk.f32.mxu0 %vm740_vm13, %v973_v54  ;;  %2028 = vmatpush3.msk.msra.mxu0 %vm509_vm5, %v1889_v58  ;;  %vm1377_vm5 = vcmask 261120  }
 0x6a6   : > { %2035 = vmatprep.subr.msk.mxu0 %vm2569_vm2, %v2324_v45  ;;  %1899 = vmatprep.mubr.msk.bf16.mxu1 %vm1377_vm5, %v2214_v19 }
 0x6a8   : > { %2025 = vmatmul.mubr.msk.f32.gmra.mrb[14].mxu0 %vm740_vm13, %v974_v55  ;;  %v2216_v55 = vld [vmem:[%s2733_s5] ss:$8 sps:$4 sm:$0xff]  }
 0x76e   : > { %v2015_v2 = vpop.f32.mrb[8].mxu0 }
 0x76f   : > { %v1053_v59 = vpop.f32.mrb[9].mxu0 }
 0x773   : > { %v2018_v60 = vpop.f32.mrb[10].mxu0 }
 0x774   : > { %v1063_v6 = vpop.f32.mrb[11].mxu0 }
 0x777   : > { %v2023_v61 = vpop.f32.mrb[12].mxu0 }
 0x778   : > { %v1158_v62 = vmax.f32 %v2015_v2, %v2023_v61  ;;  %v1138_v63 = vpop.f32.mrb[13].mxu0 }
 0x779   : > { %v1157_v0 = vmax.f32 %v1053_v59, %v1138_v63 }
 0x77b   : > { %v2026_v1 = vpop.f32.mrb[14].mxu0  ;;  %2029 = vmatprep.mubr.msk.f32.mxu0 %vm1168_vm3, %v1157_v0 }
 0x77c   : > { %v1160_v3 = vmax.f32 %v2018_v60, %v2026_v1  ;;  %v1148_v5 = vpop.f32.mrb[15].mxu0  ;;  %2030 = vmatmul.mubr.msk.f32.vlgmr.msra.gmra.mrb[16].mxu0 %vm1168_vm3, %v1158_v62 }
 0x77d   : > { %v1159_v7 = vmax.f32 %v1063_v6, %v1148_v5  ;;  %2036 = vmatpush3.msk.msra.mxu0 %vm2569_vm2, %v2324_v45  ;;  %v1336_v45 = vld [vmem:[%s2734_s6 + $0x8] sm:$0xff] }
 0x77e   : > { %1646 = vmatprep.subr.bf16.mxu0 %v2321_v11 }
 0x77f   : > { %2032 = vmatprep.mubr.msk.f32.mxu0 %vm1168_vm3, %v1159_v7 }
 0x780   : > { %2033 = vmatmul.mubr.msk.f32.gmra.mrb[18].mxu0 %vm1168_vm3, %v1160_v3 }
 0x84f   : > { %v2031_v8 = vpop.f32.mrb[16].mxu0 }
 0x850   : > { %v1250_v9 = vpop.f32.mrb[17].mxu0 }
 0x851   : > { %v2131_v10 = vpack.i.bf16 %v2031_v8, %v1250_v9  ;;  %v1325_v12 = vpack.c.bf16 %v2031_v8, %v1250_v9 }
 0x853   : > { %2132 = vrot.lane.b32.xlu0 %v2131_v10, %s2746_s16  ;;  %v2034_v13 = vpop.f32.mrb[18].mxu0  ;;  %1385 = vmatpush1.bf16.msra.mxu1 %v1325_v12 }
 0x854   : > { %v1260_v14 = vpop.f32.mrb[19].mxu0  ;;  %1386 = vmatprep.subr.bf16.mxu1 %v2321_v11 }
 0x855   : > { %v2146_v15 = vpack.i.bf16 %v2034_v13, %v1260_v14  ;;  %v1326_v16 = vpack.c.bf16 %v2034_v13, %v1260_v14 }
 0x857   : > { %2147 = vrot.lane.b32.xlu0 %v2146_v15, %s2754_s24  ;;  %2137 = vrot.lane.b32.xlu1 %v2146_v15, %s2746_s16  ;;  %s1850_s16 = sshll.u32 %s375_s0, 2 }
 0x858   : > { %1387 = vmatpush1.bf16.msra.mxu1 %v1326_v16  ;;  %s377_s25 = scalar_lea.vmem [#allocation2], %s1850_s16  ;;  %s2257_s16 = scalar_lea.vmem %s2256_s13, 128 }
 0x859   : > { %1388 = vmatprep.subr.bf16.mxu1 %v2321_v11  ;;  %s1787_s15 = sshll.u32 %s377_s25, 4  ;;  %s2687_s15 = int_to_ptr.vmem [resolvable:$true] %s1787_s15 }
 0x85a   : > { %p2258_p0 = scmp.lt.s32.totalorder %s2687_s15, %s2256_s13 }
 0x85b   : > { %2157 = vrot.lane.b32.xlu0 %v2146_v15, %s2755_s29  ;;  %2142 = vrot.lane.b32.xlu1 %v2131_v10, %s2754_s24 }
 0x85f   : > { %2167 = vrot.lane.b32.xlu0 %v2146_v15, %s2756_s30  ;;  %2152 = vrot.lane.b32.xlu1 %v2131_v10, %s2755_s29 }
 0x863   : > { %1346 = vperm.xlu0 %2109, %v1336_v45   ;;  %2162 = vrot.lane.b32.xlu1 %v2131_v10, %s2756_s30 }
 0x867   : > { %1356 = vperm.xlu0 %2109, %v1338_v17   ;;  %1341 = vperm.xlu1 %2110, %v1335_v18  }
 0x86b   : > { %1351 = vperm.xlu1 %2110, %v1337_v20  }
 0x8c5   : > { %v2133_v21 = vpop.permute.xlu0 %2132 }
 0x8c6   : > { %v2135_v22 = vunpack.i.h.bf16 %v2133_v21  ;;  %v2134_v23 = vunpack.i.l.bf16 %v2133_v21 }
 0x8c8   : > { %v1327_v24 = vpack.c.bf16 %v2135_v22, %v2134_v23 }
 0x8c9   : > { %v2138_v25 = vpop.permute.xlu1 %2137  ;;  %v2148_v29 = vpop.permute.xlu0 %2147 }
 0x8ca   : > { %v2140_v26 = vunpack.i.h.bf16 %v2138_v25  ;;  %v2139_v27 = vunpack.i.l.bf16 %v2138_v25  ;;  %1389 = vmatpush1.bf16.msra.mxu1 %v1327_v24  ;;  %v2150_v33 = vunpack.i.h.bf16 %v2148_v29  ;;  %v2149_v34 = vunpack.i.l.bf16 %v2148_v29 }
 0x8cb   : > { %1390 = vmatprep.subr.bf16.mxu1 %v2321_v11 }
 0x8cc   : > { %v1328_v28 = vpack.c.bf16 %v2140_v26, %v2139_v27  ;;  %v1330_v38 = vpack.c.bf16 %v2150_v33, %v2149_v34 }
 0x8cd   : > { %v2143_v30 = vpop.permute.xlu1 %2142  ;;  %v2158_v41 = vpop.permute.xlu0 %2157 }
 0x8ce   : > { %v2145_v31 = vunpack.i.h.bf16 %v2143_v30  ;;  %v2144_v32 = vunpack.i.l.bf16 %v2143_v30  ;;  %1391 = vmatpush1.bf16.msra.mxu1 %v1328_v28  ;;  %v2160_v42 = vunpack.i.h.bf16 %v2158_v41  ;;  %v2159_v43 = vunpack.i.l.bf16 %v2158_v41 }
 0x8cf   : > { %1392 = vmatprep.subr.bf16.mxu1 %v2321_v11 }
 0x8d0   : > { %v1329_v35 = vpack.c.bf16 %v2145_v31, %v2144_v32  ;;  %v1332_v47 = vpack.c.bf16 %v2160_v42, %v2159_v43  ;;  %v1623_v42 = vld [vmem:[%s2736_s8 + $0x8] sm:$0xff]  ;;  %v1622_v43 = vld [vmem:[%s2736_s8] sm:$0xff] }
 0x8d1   : > { %v2153_v37 = vpop.permute.xlu1 %2152  ;;  %v2168_v50 = vpop.permute.xlu0 %2167 }
 0x8d2   : > { %1393 = vmatpush1.bf16.msra.mxu1 %v1329_v35  ;;  %v2155_v39 = vunpack.i.h.bf16 %v2153_v37  ;;  %v2154_v40 = vunpack.i.l.bf16 %v2153_v37  ;;  %v2170_v51 = vunpack.i.h.bf16 %v2168_v50  ;;  %v2169_v52 = vunpack.i.l.bf16 %v2168_v50 }
 0x8d3   : > { %1394 = vmatprep.subr.bf16.mxu1 %v2321_v11 }
 0x8d4   : > { %v1331_v44 = vpack.c.bf16 %v2155_v39, %v2154_v40  ;;  %v1334_v54 = vpack.c.bf16 %v2170_v51, %v2169_v52 }
 0x8d5   : > { %v2163_v46 = vpop.permute.xlu1 %2162 }
 0x8d6   : > { %1395 = vmatpush1.bf16.msra.mxu1 %v1330_v38  ;;  %v2165_v48 = vunpack.i.h.bf16 %v2163_v46  ;;  %v2164_v49 = vunpack.i.l.bf16 %v2163_v46 }
 0x8d7   : > { %1396 = vmatprep.subr.bf16.mxu1 %v2321_v11 }
 0x8d8   : > { %v1333_v53 = vpack.c.bf16 %v2165_v48, %v2164_v49 }
 0x8da   : > { %1397 = vmatpush1.bf16.msra.mxu1 %v1331_v44  ;;  %v2222_v44 = vld [vmem:[%s2735_s7 + $0x4] ss:$8 sps:$4 sm:$0xff]  }
 0x8db   : > { %1398 = vmatprep.subr.bf16.mxu1 %v2321_v11 }
 0x8de   : > { %1399 = vmatpush1.bf16.msra.mxu1 %v1332_v47 }
 0x8df   : > { %1400 = vmatprep.subr.bf16.mxu1 %v2321_v11 }
 0x8e2   : > { %1401 = vmatpush1.bf16.msra.mxu1 %v1333_v53  ;;  %v1347_v60 = vpop.permute.xlu0 %1346 }
 0x8e3   : > { %1402 = vmatprep.subr.bf16.mxu1 %v2321_v11 }
 0x8e6   : > { %1403 = vmatpush1.bf16.msra.mxu1 %v1334_v54  ;;  %v1342_v36 = vpop.permute.xlu1 %1341  ;;  %v1357_v9 = vpop.permute.xlu0 %1356 }
 0x8e7   : > { %2043 = vmatprep.subr.bf16.mxu1 %v2317_v4 }
 0x8e9   : > { %1417 = vmatmul.mubr.bf16.vlgmr.msra.gmra.mrb[8].mxu1 %v2216_v55 }
 0x8ea   : > { %1900 = vmatprep.mubr.msk.bf16.mxu1 %vm1377_vm5, %v2217_v56  ;;  %v1352_v5 = vpop.permute.xlu1 %1351 }
 0x8f1   : > { %1425 = vmatmul.mubr.bf16.gmra.mrb[12].mxu1 %v2219_v57 }
 0x8f2   : > { %2045 = vmatprep.mubr.msk.bf16.mxu1 %vm2316_vm0, %v2317_v4  ;;  %vm1752_vm0 = vcmask 125952  }
 0x9bc   : > { %v1418_v58 = vpop.f32.mrb[8].mxu1 }
 0x9bd   : > { %v1419_v2 = vadd.f32 %v1418_v58, %v1342_v36  ;;  %v1420_v59 = vpop.f32.mrb[9].mxu1 }
 0x9be   : > { %v1421_v6 = vpop.f32.mrb[10].mxu1 }
 0x9bf   : > { %v1433_v61 = vmax.f32 %v1419_v2, 0.0  ;;  %v1422_v62 = vadd.f32 %v1421_v6, %v1347_v60  ;;  %v1423_v63 = vpop.f32.mrb[11].mxu1 }
 0x9c1   : > { %v1434_v0 = vmax.f32 %v1422_v62, 0.0  ;;  %v1437_v1 = vsel %vm740_vm13, %v1433_v61, -inf }
 0x9c2   : > { %1438 = vmax.xlane.f32.xlu1 %v1437_v1 }
 0x9c3   : > { %v1440_v3 = vsel %vm740_vm13, %v1434_v0, -inf }
 0x9c4   : > { %v1426_v7 = vpop.f32.mrb[12].mxu1  ;;  %1441 = vmax.xlane.f32.xlu0 %v1440_v3 }
 0x9c5   : > { %v1427_v8 = vadd.f32 %v1426_v7, %v1352_v5  ;;  %v1428_v4 = vpop.f32.mrb[13].mxu1 }
 0x9c6   : > { %v1429_v10 = vpop.f32.mrb[14].mxu1 }
 0x9c7   : > { %v1435_v12 = vmax.f32 %v1427_v8, 0.0  ;;  %v1430_v13 = vadd.f32 %v1429_v10, %v1357_v9  ;;  %v1431_v14 = vpop.f32.mrb[15].mxu1 }
 0x9c8   : > { %v2220_v14 = vld [vmem:[%s2735_s7] ss:$8 sps:$4 sm:$0xff]  }
 0x9c9   : > { %v1436_v15 = vmax.f32 %v1430_v13, 0.0  ;;  %v1443_v16 = vsel %vm740_vm13, %v1435_v12, -inf }
 0x9ca   : > { %1444 = vmax.xlane.f32.xlu0 %v1443_v16 }
 0x9cb   : > { %v1446_v45 = vsel %vm740_vm13, %v1436_v15, -inf }
 0x9cc   : > { %1447 = vmax.xlane.f32.xlu1 %v1446_v45 }
 0xa4f   : > { %v1439_v17 = vpop.xlane.xlu1 %1438 }
 0xa50   : > { %v1449_v18 = vadd.f32 1e-05, %v1439_v17 }
 0xa51   : > { %v1442_v19 = vpop.xlane.xlu0 %1441 }
 0xa52   : > { %2235 = vrcp.f32 %v1449_v18  ;;  %v1450_v20 = vadd.f32 1e-05, %v1442_v19 }
 0xa54   : > { %2237 = vrcp.f32 %v1450_v20 }
 0xa57   : > { %v1445_v21 = vpop.xlane.xlu0 %1444 }
 0xa58   : > { %v1451_v22 = vadd.f32 1e-05, %v1445_v21 }
 0xa59   : > { %v1448_v23 = vpop.xlane.xlu1 %1447 }
 0xa5a   : > { %2239 = vrcp.f32 %v1451_v22  ;;  %v1452_v24 = vadd.f32 1e-05, %v1448_v23 }
 0xa5c   : > { %v2236_v25 = vpop.eup %2235  ;;  %2241 = vrcp.f32 %v1452_v24 }
 0xa5d   : > { %v1457_v26 = vmul.f32 %v2236_v25, %v1433_v61  ;;  %v1703_v25 = vld [vmem:[%s2738_s10] sm:$0xf] }
 0xa5e   : > { %v2238_v27 = vpop.eup %2237 }
 0xa5f   : > { %v1458_v28 = vmul.f32 %v2238_v27, %v1434_v0  ;;  %2037 = vmatprep.mubr.msk.f32.mxu0 %vm740_vm13, %v1457_v26 }
 0xa61   : > { %2038 = vmatmul.mubr.msk.f32.vlgmr.msra.gmra.mrb[20].mxu0 %vm740_vm13, %v1458_v28 }
 0xa64   : > { %v2240_v29 = vpop.eup %2239 }
 0xa65   : > { %v1459_v30 = vmul.f32 %v2240_v29, %v1435_v12 }
 0xa66   : > { %v2242_v31 = vpop.eup %2241 }
 0xa67   : > { %2040 = vmatprep.mubr.msk.f32.mxu0 %vm740_vm13, %v1459_v30  ;;  %v1460_v32 = vmul.f32 %v2242_v31, %v1436_v15 }
 0xa69   : > { %2041 = vmatmul.mubr.msk.f32.gmra.mrb[22].mxu0 %vm740_vm13, %v1460_v32 }
 0xa6a   : > { %1908 = vmatprep.mubr.msk.bf16.mxu0 %vm1377_vm5, %v2222_v44 }
 0xb34   : > { %v2039_v33 = vpop.f32.mrb[20].mxu0 }
 0xb35   : > { %v1539_v34 = vpop.f32.mrb[21].mxu0 }
 0xb36   : > { %v2171_v35 = vpack.i.bf16 %v2039_v33, %v1539_v34  ;;  %v1612_v37 = vpack.c.bf16 %v2039_v33, %v1539_v34 }
 0xb38   : > { %2172 = vrot.lane.b32.xlu0 %v2171_v35, %s2757_s12  ;;  %1647 = vmatpush1.bf16.msra.mxu0 %v1612_v37 }
 0xb39   : > { %1648 = vmatprep.subr.bf16.mxu0 %v2321_v11 }
 0xb3c   : > { %v2042_v38 = vpop.f32.mrb[22].mxu0 }
 0xb3d   : > { %v1549_v39 = vpop.f32.mrb[23].mxu0 }
 0xb3e   : > { %v2186_v40 = vpack.i.bf16 %v2042_v38, %v1549_v39  ;;  %v1613_v41 = vpack.c.bf16 %v2042_v38, %v1549_v39 }
 0xb40   : > { %2187 = vrot.lane.b32.xlu0 %v2186_v40, %s2754_s24  ;;  %2177 = vrot.lane.b32.xlu1 %v2186_v40, %s2757_s12  ;;  %s2251_s12 = scalar_lea.vmem %s2687_s15, 64 }
 0xb41   : > { %1649 = vmatpush1.bf16.msra.mxu0 %v1613_v41  ;;  %p2252_p11 = scmp.ne.s32.totalorder %s2687_s15, %s2251_s12  ;;  %p2259_p1 = scmp.lt.s32.totalorder %s2257_s16, %s2251_s12 }
 0xb42   : > { %1650 = vmatprep.subr.bf16.mxu0 %v2321_v11 }
 0xb43   : > { %p2253_p12 = pnand %p2252_p11, %p2424_p5  ;;  %p2260_p2 = por %p2259_p1, %p2258_p0 }
 0xb44   : > { %2197 = vrot.lane.b32.xlu0 %v2186_v40, %s2755_s29  ;;  %2182 = vrot.lane.b32.xlu1 %v2171_v35, %s2754_s24 }
 0xb45   : > { %p2254_p13 = pneg %p2253_p12 }
 0xb47   : > { %p2261_p3 = pnand %p2260_p2, %p2254_p13 }
 0xb48   : > { %2207 = vrot.lane.b32.xlu0 %v2186_v40, %s2756_s30  ;;  %2192 = vrot.lane.b32.xlu1 %v2171_v35, %s2755_s29 }
 0xb4c   : > { %1631 = vperm.xlu0 %2109, %v1623_v42   ;;  %2202 = vrot.lane.b32.xlu1 %v2171_v35, %s2756_s30  ;;  %v1701_v35 = vld [vmem:[%s2737_s9] sm:$0x3]  ;;  %s2685_s30 = scalar_lea.hbm %s2739_s11, %s1911_s14 }
 0xb50   : > { %1626 = vperm.xlu1 %2110, %v1622_v43  }
 0xbaa   : > { %v2173_v46 = vpop.permute.xlu0 %2172 }
 0xbab   : > { %v2175_v47 = vunpack.i.h.bf16 %v2173_v46  ;;  %v2174_v48 = vunpack.i.l.bf16 %v2173_v46 }
 0xbad   : > { %v1614_v49 = vpack.c.bf16 %v2175_v47, %v2174_v48 }
 0xbaf   : > { %1651 = vmatpush1.bf16.msra.mxu0 %v1614_v49 }
 0xbb0   : > { %1652 = vmatprep.subr.bf16.mxu0 %v2321_v11 }
 0xbb2   : > { %v2178_v50 = vpop.permute.xlu1 %2177  ;;  %v2188_v54 = vpop.permute.xlu0 %2187 }
 0xbb3   : > { %v2180_v51 = vunpack.i.h.bf16 %v2178_v50  ;;  %v2179_v52 = vunpack.i.l.bf16 %v2178_v50  ;;  %v2190_v36 = vunpack.i.h.bf16 %v2188_v54  ;;  %v2189_v58 = vunpack.i.l.bf16 %v2188_v54 }
 0xbb5   : > { %v1615_v53 = vpack.c.bf16 %v2180_v51, %v2179_v52  ;;  %v1617_v60 = vpack.c.bf16 %v2190_v36, %v2189_v58 }
 0xbb6   : > { %v2183_v55 = vpop.permute.xlu1 %2182  ;;  %v2198_v62 = vpop.permute.xlu0 %2197 }
 0xbb7   : > { %v2185_v56 = vunpack.i.h.bf16 %v2183_v55  ;;  %v2184_v57 = vunpack.i.l.bf16 %v2183_v55  ;;  %1653 = vmatpush1.bf16.msra.mxu0 %v1615_v53  ;;  %v2200_v63 = vunpack.i.h.bf16 %v2198_v62  ;;  %v2199_v0 = vunpack.i.l.bf16 %v2198_v62 }
 0xbb8   : > { %1654 = vmatprep.subr.bf16.mxu0 %v2321_v11 }
 0xbb9   : > { %v1616_v2 = vpack.c.bf16 %v2185_v56, %v2184_v57  ;;  %v1619_v5 = vpack.c.bf16 %v2200_v63, %v2199_v0 }
 0xbba   : > { %v2193_v59 = vpop.permute.xlu1 %2192  ;;  %v2208_v4 = vpop.permute.xlu0 %2207 }
 0xbbb   : > { %1655 = vmatpush1.bf16.msra.mxu0 %v1616_v2  ;;  %v2195_v6 = vunpack.i.h.bf16 %v2193_v59  ;;  %v2194_v61 = vunpack.i.l.bf16 %v2193_v59  ;;  %v2210_v9 = vunpack.i.h.bf16 %v2208_v4  ;;  %v2209_v10 = vunpack.i.l.bf16 %v2208_v4 }
 0xbbc   : > { %1656 = vmatprep.subr.bf16.mxu0 %v2321_v11 }
 0xbbd   : > { %v1618_v1 = vpack.c.bf16 %v2195_v6, %v2194_v61  ;;  %v1621_v13 = vpack.c.bf16 %v2210_v9, %v2209_v10 }
 0xbbe   : > { %v2203_v3 = vpop.permute.xlu1 %2202 }
 0xbbf   : > { %1657 = vmatpush1.bf16.msra.mxu0 %v1617_v60  ;;  %v2205_v7 = vunpack.i.h.bf16 %v2203_v3  ;;  %v2204_v8 = vunpack.i.l.bf16 %v2203_v3 }
 0xbc0   : > { %1658 = vmatprep.subr.bf16.mxu0 %v2321_v11 }
 0xbc1   : > { %v1620_v12 = vpack.c.bf16 %v2205_v7, %v2204_v8 }
 0xbc3   : > { %1659 = vmatpush1.bf16.msra.mxu0 %v1618_v1 }
 0xbc4   : > { %1660 = vmatprep.subr.bf16.mxu0 %v2321_v11 }
 0xbc7   : > { %1661 = vmatpush1.bf16.msra.mxu0 %v1619_v5 }
 0xbc8   : > { %1662 = vmatprep.subr.bf16.mxu0 %v2321_v11 }
 0xbcb   : > { %1663 = vmatpush1.bf16.msra.mxu0 %v1620_v12  ;;  %v1632_v18 = vpop.permute.xlu0 %1631 }
 0xbcc   : > { %1664 = vmatprep.subr.bf16.mxu0 %v2321_v11 }
 0xbcf   : > { %1665 = vmatpush1.bf16.msra.mxu0 %v1621_v13  ;;  %v1627_v15 = vpop.permute.xlu1 %1626 }
 0xbd2   : > { %1679 = vmatmul.mubr.bf16.vlgmr.msra.gmra.mrb[24].mxu0 %v2220_v14 }
 0xca5   : > { %v1680_v16 = vpop.f32.mrb[24].mxu0 }
 0xca6   : > { %v1681_v45 = vadd.f32 %v1680_v16, %v1627_v15  ;;  %v1682_v17 = vpop.f32.mrb[25].mxu0 }
 0xca7   : > { %v1683_v19 = vpop.f32.mrb[26].mxu0 }
 0xca8   : > { %v1687_v20 = vmax.f32 %v1681_v45, 0.0  ;;  %v1684_v21 = vadd.f32 %v1683_v19, %v1632_v18  ;;  %v1685_v22 = vpop.f32.mrb[27].mxu0 }
 0xcaa   : > { %v1688_v23 = vmax.f32 %v1684_v21, 0.0  ;;  %v1689_v24 = vsel %vm396_vm4, %v1687_v20, -inf }
 0xcab   : > { %1690 = vmax.xlane.f32.xlu1 %v1689_v24 }
 0xcac   : > { %v1692_v11 = vsel %vm396_vm4, %v1688_v23, -inf }
 0xcad   : > { %1693 = vmax.xlane.f32.xlu0 %v1692_v11 }
 0xcc3   : > { %1706 = vperm.xlu0 %2109, %v1703_v25  }
 0xd38   : > { %v1691_v26 = vpop.xlane.xlu1 %1690 }
 0xd39   : > { %v1695_v27 = vadd.f32 1e-05, %v1691_v26 }
 0xd3a   : > { %v1694_v28 = vpop.xlane.xlu0 %1693 }
 0xd3b   : > { %2243 = vrcp.f32 %v1695_v27  ;;  %v1696_v29 = vadd.f32 1e-05, %v1694_v28 }
 0xd3d   : > { %2245 = vrcp.f32 %v1696_v29 }
 0xd42   : > { %v1707_v37 = vpop.permute.xlu0 %1706 }
 0xd45   : > { %v2244_v30 = vpop.eup %2243 }
 0xd46   : > { %v1699_v32 = vmul.f32 %v2244_v30, %v1687_v20 }
 0xd47   : > { %v2246_v31 = vpop.eup %2245 }
 0xd48   : > { %v1700_v33 = vmul.f32 %v2246_v31, %v1688_v23 }
 0xd4a   : > { %v1702_v34 = vpack.c.bf16 %v1700_v33, %v1699_v32 }
 0xd4c   : > { %2044 = vmatpush3.bf16.msra.mxu1 %v1702_v34 }
 0xd4f   : > { %2046 = vmatmul.mubr.msk.bf16.vlgmr.msra.gmra.mrb[16].mxu1 %vm396_vm4, %v1701_v35 }
 0xe22   : > { %v1746_v38 = vpop.f32.mrb[16].mxu1 }
 0xe23   : > { %v1747_v39 = vadd.f32 %v1746_v38, %v1707_v37  ;;  %v2047_v40 = vpop.f32.mrb[17].mxu1 }
 0xe24   : > { %v1749_v41 = vpop.f32.mrb[18].mxu1 }
 0xe25   : > { %v1753_v42 = vsel %vm1752_vm0, %v1747_v39, -inf  ;;  %v2048_v43 = vpop.f32.mrb[19].mxu1 }
 0xe26   : > { %v1754_v44 = vrot.slane %v1753_v42, 4 }
 0xe28   : > { %v1755_v46 = vmax.f32 %v1753_v42, %v1754_v44 }
 0xe2a   : > { %v1756_v47 = vrot.slane %v1755_v46, 2 }
 0xe2c   : > { %v1757_v48 = vmax.f32 %v1755_v46, %v1756_v47 }
 0xe2e   : > { %v1758_v49 = vrot.slane %v1757_v48, 1 }
 0xe30   : > { %v1759_v50 = vmax.f32 %v1757_v48, %v1758_v49 }
 0xe32   : > { %v1760_v51 = vsub.f32 %v1747_v39, %v1759_v50 }
 0xe34   : > { %v1761_v52 = vmul.f32 1.442695, %v1760_v51 }
 0xe36   : > { %2247 = vpow2.f32 %v1761_v52 }
 0xe40   : > { %v2248_v53 = vpop.eup %2247 }
 0xe41   : > { %v1763_v54 = vsel %vm1752_vm0, %v2248_v53, 0.0 }
 0xe42   : > { %v1764_v55 = vrot.slane %v1763_v54, 4 }
 0xe44   : > { %v1765_v56 = vadd.f32 %v1764_v55, %v1763_v54 }
 0xe46   : > { %v1766_v57 = vrot.slane %v1765_v56, 2 }
 0xe48   : > { %v1767_v36 = vadd.f32 %v1766_v57, %v1765_v56 }
 0xe4a   : > { %v1768_v58 = vrot.slane %v1767_v36, 1 }
 0xe4c   : > { %v1769_v2 = vadd.f32 %v1768_v58, %v1767_v36 }
 0xe4e   : > { %2249 = vrcp.f32 %v1769_v2 }
 0xe58   : > { %v2250_v59 = vpop.eup %2249 }
 0xe59   : > { %v1771_v60 = vmul.f32 %v2250_v59, %v2248_v53 }
 0xe5b   : > { %1772 = vst.msk [vmem:[%s377_s25] sm:$0xf] %vm1752_vm0, %v1771_v60 }
 0xe5c   : > { %2264 = shalt.err (!%p2261_p3)
}
 0xe5d   : > { %s2265_s0 = scalar_lea.hbm %s2685_s30, 64  ;;  %s2269_s24 = scalar_lea.hbm %s2739_s11, 128 }
 0xe5e   : > { %p2266_p4 = scmp.ne.s32.totalorder %s2685_s30, %s2265_s0  ;;  %p2270_p9 = scmp.lt.u32.totalorder %s2685_s30, %s2739_s11 }
 0xe5f   : > { %p2271_p10 = scmp.lt.u32.totalorder %s2269_s24, %s2265_s0  ;;  %p2273_p12 = scmp.lt.u32.totalorder %s2265_s0, %s2685_s30 }
 0xe60   : > { %p2267_p7 = pnand %p2266_p4, %p2424_p5 }
 0xe61   : > { %p2272_p11 = por %p2271_p10, %p2270_p9 }
 0xe62   : > { %p2268_p8 = pneg %p2267_p7 }
 0xe63   : > { %p2274_p13 = por %p2273_p12, %p2272_p11 }
 0xe65   : > { %p2275_p0 = pnand %p2274_p13, %p2268_p8 }
 0xe67   : > { %2278 = shalt.err (!%p2275_p0)
}
 0xe68   : > { %2060 = dma.vmem_to_hbm [thread:$0]  (%p2424_p5), %s2687_s15, 64, %s2685_s30, %s1774_s22  }
 0xe69 PF: > { %p2066_p1 = scmp.ge.s32.totalorder %s2313_s20, 2  ;;  %s1799_s12 = sand.u32 1, %s2301_s17  }
 0xe6a   : > { %s1800_s13 = scalar_lea.sflag [#allocation3], %s1799_s12 }
 0xe6b   : > { %p2063_p2 = pnand %p2066_p1, %p2428_p6 }
 0xe6d   : > { %2296 = dma.done.wait (!%p2063_p2), %s1800_s13, 64  }
 0xe6e   : > { %2298 = vsyncadd (!%p2063_p2), %s1800_s13, 4294967232  ;;  %p21_p3 = scmp.ge.s32.totalorder %s2411_s23, 4   ;;  %s2758_s17 = smov %s2305_s18 }
 0xe6f   : > { %s2759_s18 = smov %s2309_s19  ;;  %s2760_s19 = smov %s2422_s26 }
 0xe70   : > { %s2761_s20 = smov %s2411_s23  ;;  %23 = sbr.rel (!%p21_p3) target bundleno = 5 (0x5), region = 99 }
 0xe77   :  { %1805 = vsyncpa [#allocation3], 1 }
 0xe78   :  { %1807 = vsyncpa [#allocation3 + $0x1], 1 }

</bundles_post_ra>
